<compile_context>
chip_gen: v5e
topology: v5e:2x2
jax: 0.10.0
libtpu: 0.0.40
codegen_flags: <defaults>
</compile_context>

<pallas_src>
import jax
import jax.numpy as jnp
from jax.experimental import pallas as pl
from jax.experimental.pallas import tpu as pltpu


def _make_attention_kernel(n_valid: int, tn: int, ragged_n: bool):
    """Build the kernel body (closure over static bag-tiling parameters)."""

    def kernel(x_ref, w_ref, out_ref, s_ref, m_scr, l_scr, acc_scr):
        # x_ref:   (TB, TN, D)  instance features for TB bags / TN instances
        # w_ref:   (1, D)       nn.Linear(embed_dim, 1) weight, lane-dense, f32
        # out_ref: (TB, D)      attention-weighted mean (written on last N step)
        # s_ref:   (TB, TN)     raw gate scores (softmax-normalized in wrapper)
        # m_scr/l_scr: (TB, 1)  online-softmax running max / denominator (f32)
        # acc_scr: (TB, D)      f32 weighted-sum accumulator
        j = pl.program_id(1)

        @pl.when(j == 0)
        def _():
            m_scr[...] = jnp.full_like(m_scr, -jnp.inf)
            l_scr[...] = jnp.zeros_like(l_scr)
            acc_scr[...] = jnp.zeros_like(acc_scr)

        x = x_ref[...]                       # (TB, TN, D), input dtype
        w = w_ref[...]                       # (1, D), f32

        # Gate score s[b, n] = sum_d tanh(x[b, n, d]) * w[d].
        # VPU tanh/multiply + XLU lane reduce instead of a 1-column MXU matmul;
        # the f32 weight promotes the product so the reduce accumulates in f32.
        # nn.Dropout is identity at inference; the Linear bias is dropped on
        # purpose (softmax over N is shift-invariant -> both outputs unchanged).
        s = jnp.sum(jnp.tanh(x) * w, axis=-1)                    # (TB, TN) f32

        if ragged_n:
            # Mask bag positions past N so they cannot contaminate the softmax.
            n_idx = jax.lax.broadcasted_iota(jnp.int32, s.shape, 1) + j * tn
            s = jnp.where(n_idx < n_valid, s, -jnp.inf)

        # Raw scores out (lane-dense); OOB columns of a ragged tail block are
        # dropped by the pipeline.
        s_ref[...] = s.astype(s_ref.dtype)

        # Online softmax over the bag axis N (streamed across grid axis 1).
        m_prev = m_scr[...]                                      # (TB, 1)
        m_new = jnp.maximum(m_prev, jnp.max(s, axis=-1, keepdims=True))
        alpha = jnp.exp(m_prev - m_new)                          # (TB, 1)
        p = jnp.exp(s - m_new)                                   # (TB, TN) f32
        l_scr[...] = alpha * l_scr[...] + jnp.sum(p, axis=-1, keepdims=True)
        # Weighted accumulate over N: x stays in its input dtype; the f32
        # softmax weights promote the products; reduce + scratch are f32.
        acc_scr[...] = alpha * acc_scr[...] + jnp.sum(x * p[:, :, None], axis=1)
        m_scr[...] = m_new

        @pl.when(j == pl.num_programs(1) - 1)
        def _():
            # Normalizer is O(TB) per batch tile (not per element), so the
            # exact reciprocal is already free; approx=True would gain nothing
            # while costing f32 accuracy of the output.
            out_ref[...] = (
                acc_scr[...] * pl.reciprocal(l_scr[...], approx=False)
            ).astype(out_ref.dtype)

    return kernel


def _round_up(v: int, m: int) -> int:
    return -(-v // m) * m


def attention_forward(x, weight, bias=None):
    """MIL Attention (version='v1') forward.

    x:      (B, N, D)
    weight: (1, D) torch-style nn.Linear(embed_dim, 1) weight
    bias:   (1,)   ignored -- softmax over N is invariant to a constant shift
    returns (out, a) with out: (B, D), a: (B, N, 1)
    """
    del bias  # mathematically a no-op for both outputs (softmax shift-invariance)
    B, N, D = map(int, x.shape)

    itemsize = jnp.dtype(x.dtype).itemsize
    d_pad = _round_up(D, 128)           # lane padding of the last dim in VMEM

    def step_bytes(tb, tn):
        # VMEM working set of one grid step: double-buffered pipeline operands
        # + whole-tile f32 temporaries (tanh(x)*w, x*p) + persistent scratch.
        tb8 = _round_up(tb, 8)
        tn8 = _round_up(tn, 8)
        x_blk = tb * tn8 * d_pad * itemsize
        f32_tmp = tb * tn8 * d_pad * 4
        s_blk = tb8 * _round_up(tn, 128) * 4
        o_blk = tb8 * d_pad * itemsize
        w_blk = 8 * d_pad * 4
        scratch = tb8 * d_pad * 4 + 2 * tb8 * 128 * 4
        return 2 * (x_blk + s_blk + o_blk + w_blk) + 2 * f32_tmp + scratch

    # Per-generation VMEM capacity (v7x: 64 MiB per TensorCore, v5e/v6e: 128 MiB).
    try:
        vmem_cap = int(pltpu.get_tpu_info().vmem_capacity_bytes)
        if vmem_cap <= 0:
            raise ValueError("bad vmem capacity")
    except Exception:
        vmem_cap = 64 << 20             # conservative fallback (v7x per-core)
    budget = (vmem_cap * 7) // 10       # headroom for Mosaic-internal scratch

    # ---- bag-axis tile: whole N if it fits, else a lane-dense multiple of 128.
    tb_min = B if B < 8 else 8
    if N <= 128 or step_bytes(tb_min, N) <= budget:
        tn = N
    else:
        tn = 128
        while tn + 128 < N and step_bytes(tb_min, tn + 128) <= budget:
            tn += 128
    ragged_n = (N % tn) != 0
    # TODO(synk): for extreme embed dims (tb_min * 128 * D not fitting VMEM) a
    # D-axis tile with partial lane reduces would also be needed.

    # ---- batch-axis tile: largest sublane-dense tile that fits the budget.
    if B <= 8:
        tb = B                           # full-extent block (B may be < 8)
    else:
        tb = 8
        tb_cap = min(1024, _round_up(B, 8))
        while tb + 8 <= tb_cap and step_bytes(tb + 8, tn) <= budget:
            tb += 8
        # Keep >= 2 batch steps so the "parallel" axis can shard across both
        # v7x TensorCores (per-step overhead ~0.35 us -- negligible).
        tb = min(tb, max(8, _round_up(-(-B // 2), 8)))

    nb = -(-B // tb)
    nn_steps = -(-N // tn)

    vmem_limit = int(min(vmem_cap - (4 << 20),
                         max(step_bytes(tb, tn) + (4 << 20), 32 << 20)))

    w = weight.reshape(1, D).astype(jnp.float32)

    cost = pl.CostEstimate(
        flops=int(4 * B * N * D),
        transcendentals=int(B * N * D + 2 * B * N + B),
        bytes_accessed=int((B * N * D + B * D) * itemsize + B * N * 4 + D * 4),
    )

    out, s_raw = pl.pallas_call(
        _make_attention_kernel(N, tn, ragged_n),
        out_shape=(
            jax.ShapeDtypeStruct((B, D), x.dtype),
            jax.ShapeDtypeStruct((B, N), jnp.float32),
        ),
        grid_spec=pltpu.PrefetchScalarGridSpec(
            num_scalar_prefetch=0,
            grid=(nb, nn_steps),
            in_specs=[
                pl.BlockSpec((tb, tn, D), lambda i, j: (i, j, 0)),
                pl.BlockSpec((1, D), lambda i, j: (0, 0)),
            ],
            out_specs=[
                pl.BlockSpec((tb, D), lambda i, j: (i, 0)),
                pl.BlockSpec((tb, tn), lambda i, j: (i, j)),
            ],
            scratch_shapes=[
                pltpu.VMEM((tb, 1), jnp.float32),   # running max
                pltpu.VMEM((tb, 1), jnp.float32),   # running denominator
                pltpu.VMEM((tb, D), jnp.float32),   # weighted-sum accumulator
            ],
        ),
        compiler_params=pltpu.CompilerParams(
            dimension_semantics=("parallel", "arbitrary"),
            vmem_limit_bytes=vmem_limit,
        ),
        cost_estimate=cost,
    )(x, w)

    # Normalizing `a` needs the final max/denominator (only known after the
    # last bag tile), so the cheap O(B*N) softmax is done here instead of
    # re-reading the O(B*N*D) x a second time from HBM.
    a = jax.nn.softmax(s_raw, axis=1).astype(x.dtype)[:, :, None]
    return out, a


def attention_reference(x, weight, bias):
    # Pure-JAX reference reproducing the PyTorch forward (including the bias).
    s = jnp.einsum("bnd,od->bno", jnp.tanh(x), weight) + bias   # (B, N, 1)
    a = jax.nn.softmax(s, axis=1)
    out = jnp.sum(x * a, axis=1)
    return out, a


if __name__ == "__main__":
    key = jax.random.PRNGKey(0)
    kx, kw, kb = jax.random.split(key, 3)

    B, N, D = 2, 8, 32          # batch, bag size, embed_dim
    x = jax.random.normal(kx, (B, N, D), dtype=jnp.float32)

    # nn.Linear(embed_dim, 1): weight (1, D), bias (1,) -- deterministic init.
    weight = jax.random.normal(kw, (1, D), dtype=jnp.float32) * (1.0 / jnp.sqrt(D))
    bias = jax.random.normal(kb, (1,), dtype=jnp.float32) * 0.1

    out, a = attention_forward(x, weight, bias)
    out = jax.block_until_ready(out)
    a = jax.block_until_ready(a)

    ref_out, ref_a = attention_reference(x, weight, bias)
    assert out.shape == (B, D) and a.shape == (B, N, 1)
    assert jnp.allclose(out, ref_out, atol=1e-5, rtol=1e-5)
    assert jnp.allclose(a, ref_a, atol=1e-5, rtol=1e-5)

    print("KERNEL_OK")
</pallas_src>

<mosaic_0001>
module attributes {stable_mosaic.version = 11 : i64} {
  func.func @kernel(%arg0: i32, %arg1: i32, %arg2: memref<2x8x32xf32, #tpu.memory_space<vmem>>, %arg3: memref<1x32xf32, #tpu.memory_space<vmem>>, %arg4: memref<2x32xf32, #tpu.memory_space<vmem>>, %arg5: memref<2x8xf32, #tpu.memory_space<vmem>>, %arg6: memref<2x1xf32, #tpu.memory_space<vmem>>, %arg7: memref<2x1xf32, #tpu.memory_space<vmem>>, %arg8: memref<2x32xf32, #tpu.memory_space<vmem>>) attributes {dimension_semantics = [#tpu.dimension_semantics<parallel>, #tpu.dimension_semantics<arbitrary>], iteration_bounds = array<i64: 1, 1>, scalar_prefetch = 0 : i64, scratch_operands = 3 : i64, tpu.core_type = #tpu.core_type<tc>, window_params = [{transform_indices = @transform_0, window_bounds = array<i64: 2, 8, 32>}, {pipeline_mode = #tpu.pipeline_mode<synchronous>, transform_indices = @transform_1, window_bounds = array<i64: 1, 32>}, {transform_indices = @transform_2, window_bounds = array<i64: 2, 32>}, {transform_indices = @transform_3, window_bounds = array<i64: 2, 8>}]} {
    %c0_i32 = arith.constant 0 : i32
    %0 = arith.cmpi eq, %arg1, %c0_i32 : i32
    %1 = arith.extui %0 : i1 to i32
    %c0_i32_0 = arith.constant 0 : i32
    %2 = arith.cmpi ne, %1, %c0_i32_0 : i32
    scf.if %2 {
      %cst_24 = arith.constant 0xFF800000 : f32
      %39 = vector.broadcast %cst_24 : f32 to vector<2x1xf32>
      %c0_25 = arith.constant 0 : index
      %c0_26 = arith.constant 0 : index
      %40 = vector.load %arg6[%c0_25, %c0_26] : memref<2x1xf32, #tpu.memory_space<vmem>>, vector<2x1xf32>
      tpu.vector_store %arg6[%c0_25, %c0_26], %39 {strides = array<i32>} : memref<2x1xf32, #tpu.memory_space<vmem>>, vector<2x1xf32>,
      %cst_27 = arith.constant 0.000000e+00 : f32
      %41 = vector.broadcast %cst_27 : f32 to vector<2x1xf32>
      %c0_28 = arith.constant 0 : index
      %c0_29 = arith.constant 0 : index
      %42 = vector.load %arg7[%c0_28, %c0_29] : memref<2x1xf32, #tpu.memory_space<vmem>>, vector<2x1xf32>
      tpu.vector_store %arg7[%c0_28, %c0_29], %41 {strides = array<i32>} : memref<2x1xf32, #tpu.memory_space<vmem>>, vector<2x1xf32>,
      %cst_30 = arith.constant 0.000000e+00 : f32
      %43 = vector.broadcast %cst_30 : f32 to vector<2x32xf32>
      %c0_31 = arith.constant 0 : index
      %c0_32 = arith.constant 0 : index
      %44 = vector.load %arg8[%c0_31, %c0_32] : memref<2x32xf32, #tpu.memory_space<vmem>>, vector<2x32xf32>
      tpu.vector_store %arg8[%c0_31, %c0_32], %43 {strides = array<i32>} : memref<2x32xf32, #tpu.memory_space<vmem>>, vector<2x32xf32>,
    } else {
    }
    %c0 = arith.constant 0 : index
    %c0_1 = arith.constant 0 : index
    %c0_2 = arith.constant 0 : index
    %3 = vector.load %arg2[%c0, %c0_1, %c0_2] : memref<2x8x32xf32, #tpu.memory_space<vmem>>, vector<2x8x32xf32>
    %c0_3 = arith.constant 0 : index
    %c0_4 = arith.constant 0 : index
    %4 = vector.load %arg3[%c0_3, %c0_4] : memref<1x32xf32, #tpu.memory_space<vmem>>, vector<1x32xf32>
    %5 = math.tanh %3 : vector<2x8x32xf32>
    %6 = vector.shape_cast %4 : vector<1x32xf32> to vector<1x1x32xf32>
    %7 = vector.broadcast %6 : vector<1x1x32xf32> to vector<2x8x32xf32>
    %8 = arith.mulf %5, %7 : vector<2x8x32xf32>
    %cst = arith.constant dense<0.000000e+00> : vector<2x8xf32>
    %9 = vector.multi_reduction <add>, %8, %cst [2] : vector<2x8x32xf32> to vector<2x8xf32>
    %c0_5 = arith.constant 0 : index
    %c0_6 = arith.constant 0 : index
    %10 = vector.load %arg5[%c0_5, %c0_6] : memref<2x8xf32, #tpu.memory_space<vmem>>, vector<2x8xf32>
    tpu.vector_store %arg5[%c0_5, %c0_6], %9 {strides = array<i32>} : memref<2x8xf32, #tpu.memory_space<vmem>>, vector<2x8xf32>,
    %c0_7 = arith.constant 0 : index
    %c0_8 = arith.constant 0 : index
    %11 = vector.load %arg6[%c0_7, %c0_8] : memref<2x1xf32, #tpu.memory_space<vmem>>, vector<2x1xf32>
    %cst_9 = arith.constant dense<0xFF800000> : vector<2xf32>
    %12 = vector.multi_reduction <maximumf>, %9, %cst_9 [1] : vector<2x8xf32> to vector<2xf32>
    %13 = vector.shape_cast %12 : vector<2xf32> to vector<2x1xf32>
    %14 = arith.maximumf %11, %13 : vector<2x1xf32>
    %15 = arith.subf %11, %14 : vector<2x1xf32>
    %16 = math.exp %15 : vector<2x1xf32>
    %17 = vector.broadcast %14 : vector<2x1xf32> to vector<2x8xf32>
    %18 = arith.subf %9, %17 : vector<2x8xf32>
    %19 = math.exp %18 : vector<2x8xf32>
    %c0_10 = arith.constant 0 : index
    %c0_11 = arith.constant 0 : index
    %20 = vector.load %arg7[%c0_10, %c0_11] : memref<2x1xf32, #tpu.memory_space<vmem>>, vector<2x1xf32>
    %21 = arith.mulf %16, %20 : vector<2x1xf32>
    %cst_12 = arith.constant dense<0.000000e+00> : vector<2xf32>
    %22 = vector.multi_reduction <add>, %19, %cst_12 [1] : vector<2x8xf32> to vector<2xf32>
    %23 = vector.shape_cast %22 : vector<2xf32> to vector<2x1xf32>
    %24 = arith.addf %21, %23 : vector<2x1xf32>
    %c0_13 = arith.constant 0 : index
    %c0_14 = arith.constant 0 : index
    %25 = vector.load %arg7[%c0_13, %c0_14] : memref<2x1xf32, #tpu.memory_space<vmem>>, vector<2x1xf32>
    tpu.vector_store %arg7[%c0_13, %c0_14], %24 {strides = array<i32>} : memref<2x1xf32, #tpu.memory_space<vmem>>, vector<2x1xf32>,
    %c0_15 = arith.constant 0 : index
    %c0_16 = arith.constant 0 : index
    %26 = vector.load %arg8[%c0_15, %c0_16] : memref<2x32xf32, #tpu.memory_space<vmem>>, vector<2x32xf32>
    %27 = vector.broadcast %16 : vector<2x1xf32> to vector<2x32xf32>
    %28 = arith.mulf %27, %26 : vector<2x32xf32>
    %29 = vector.shape_cast %19 : vector<2x8xf32> to vector<2x8x1xf32>
    %30 = vector.broadcast %29 : vector<2x8x1xf32> to vector<2x8x32xf32>
    %31 = arith.mulf %3, %30 : vector<2x8x32xf32>
    %cst_17 = arith.constant dense<0.000000e+00> : vector<2x32xf32>
    %32 = vector.multi_reduction <add>, %31, %cst_17 [1] : vector<2x8x32xf32> to vector<2x32xf32>
    %33 = arith.addf %28, %32 : vector<2x32xf32>
    %c0_18 = arith.constant 0 : index
    %c0_19 = arith.constant 0 : index
    %34 = vector.load %arg8[%c0_18, %c0_19] : memref<2x32xf32, #tpu.memory_space<vmem>>, vector<2x32xf32>
    tpu.vector_store %arg8[%c0_18, %c0_19], %33 {strides = array<i32>} : memref<2x32xf32, #tpu.memory_space<vmem>>, vector<2x32xf32>,
    %c0_20 = arith.constant 0 : index
    %c0_21 = arith.constant 0 : index
    %35 = vector.load %arg6[%c0_20, %c0_21] : memref<2x1xf32, #tpu.memory_space<vmem>>, vector<2x1xf32>
    tpu.vector_store %arg6[%c0_20, %c0_21], %14 {strides = array<i32>} : memref<2x1xf32, #tpu.memory_space<vmem>>, vector<2x1xf32>,
    %c0_i32_22 = arith.constant 0 : i32
    %36 = arith.cmpi eq, %arg1, %c0_i32_22 : i32
    %37 = arith.extui %36 : i1 to i32
    %c0_i32_23 = arith.constant 0 : i32
    %38 = arith.cmpi ne, %37, %c0_i32_23 : i32
    scf.if %38 {
      %c0_24 = arith.constant 0 : index
      %c0_25 = arith.constant 0 : index
      %39 = vector.load %arg8[%c0_24, %c0_25] : memref<2x32xf32, #tpu.memory_space<vmem>>, vector<2x32xf32>
      %c0_26 = arith.constant 0 : index
      %c0_27 = arith.constant 0 : index
      %40 = vector.load %arg7[%c0_26, %c0_27] : memref<2x1xf32, #tpu.memory_space<vmem>>, vector<2x1xf32>
      %41 = tpu.reciprocal %40 : vector<2x1xf32> -> vector<2x1xf32>
      %42 = vector.broadcast %41 : vector<2x1xf32> to vector<2x32xf32>
      %43 = arith.mulf %39, %42 : vector<2x32xf32>
      %c0_28 = arith.constant 0 : index
      %c0_29 = arith.constant 0 : index
      %44 = vector.load %arg4[%c0_28, %c0_29] : memref<2x32xf32, #tpu.memory_space<vmem>>, vector<2x32xf32>
      tpu.vector_store %arg4[%c0_28, %c0_29], %43 {strides = array<i32>} : memref<2x32xf32, #tpu.memory_space<vmem>>, vector<2x32xf32>,
    } else {
    }
    return
  }
  func.func @transform_0(%arg0: i32, %arg1: i32) -> (i32, i32, i32) {
    %c0_i32 = arith.constant 0 : i32
    %c0_i32_0 = arith.constant 0 : i32
    return %arg0, %arg1, %c0_i32 : i32, i32, i32
  }
  func.func @transform_1(%arg0: i32, %arg1: i32) -> (i32, i32) {
    %c0_i32 = arith.constant 0 : i32
    %c0_i32_0 = arith.constant 0 : i32
    %c0_i32_1 = arith.constant 0 : i32
    return %c0_i32, %c0_i32_0 : i32, i32
  }
  func.func @transform_2(%arg0: i32, %arg1: i32) -> (i32, i32) {
    %c0_i32 = arith.constant 0 : i32
    %c0_i32_0 = arith.constant 0 : i32
    return %arg0, %c0_i32 : i32, i32
  }
  func.func @transform_3(%arg0: i32, %arg1: i32) -> (i32, i32) {
    %c0_i32 = arith.constant 0 : i32
    return %arg0, %arg1 : i32, i32
  }
}

</mosaic_0001>

<bundles_post_ra>
// kernel: tpu_custom_call.1
= control target key start
LH: loop header
LB: loop body
LE: loop exit
PB: predicated region body
PF: predicated region fallthrough
CT: control target
= control target key end

     0   :  { %9 = vsyncpa [#allocation6], 0  ;;  %s408_s0 = inlined_call_operand.hbm [shape: f32[2,8,32], index: 0, kind: input, shape index: {}]   ;;  %s409_s1 = inlined_call_operand.hbm [shape: f32[1,32], index: 1, kind: input, shape index: {}]   ;;  %s410_s2 = inlined_call_operand.hbm [shape: f32[2,32], index: 2, kind: output, shape index: {0}]   ;;  %s411_s3 = inlined_call_operand.hbm [shape: f32[2,8], index: 3, kind: output, shape index: {1}]  }
   0x1   :  { %10 = vsyncpa [#allocation9], 0 }
   0x2   :  { %11 = vsyncpa [#allocation7], 0 }
   0x3   :  { %12 = vsyncpa [#allocation12], 0  ;;  %s17_s14 = sshll.u32 %s408_s0, 4  ;;  %s346_s15 = smov [#allocation5]   ;;  %s18_s14 = int_to_ptr.hbm [resolvable:$true] %s17_s14 }
   0x4   :  { %s19_s16 = sshll.u32 %s346_s15, 4  ;;  %s31_s19 = sshll.u32 %s409_s1, 4  ;;  %s20_s16 = int_to_ptr.vmem [resolvable:$true] %s19_s16  ;;  %s32_s19 = int_to_ptr.hbm [resolvable:$true] %s31_s19 }
   0x5   :  { %s347_s20 = smov 128   ;;  %s348_s21 = smov 8  }
   0x6   :  { %25 = dma.hbm_to_vmem [thread:$0]  %s18_s14, 256, %s20_s16, [#allocation6], %s347_s20, %s347_s20, %s348_s21  }
   0x7   :  { %s349_s22 = smov [#allocation8]  }
   0x8   :  { %s33_s23 = sshll.u32 %s349_s22, 4  ;;  %s34_s23 = int_to_ptr.vmem [resolvable:$true] %s33_s23 }
   0x9   :  { %36 = dma.hbm_to_vmem [thread:$0]  %s32_s19, 16, %s34_s23, [#allocation9]  }
   0xa   :  { %338 = dma.done.wait [#allocation6], 256  }
   0xb   :  { %339 = vsyncadd [#allocation6], 4294967040 }
   0xc   :  { %340 = dma.done.wait [#allocation9], 16  }
   0xd   :  { %341 = vsyncadd [#allocation9], 4294967280  ;;  %v54_v0 = vld [vmem:[#allocation5] sm:$0xff]  ;;  %v381_v1 = vld [vmem:[#allocation5 + $0x8] sm:$0xff]  ;;  %vm64_vm0 = vcmask 261120   ;;  %vm49_vm1 = vcmask 1024   ;;  %v73_v11 = vlaneseq }
   0xe   :  { %230 = vtanh.f32 %v54_v0  ;;  %v229_v2 = vld [vmem:[#allocation8] ss:$0 sm:$0xff]  ;;  %v350_v9 = vmov -inf   ;;  %vm77_vm2 = vcmask 1041409   ;;  %vm80_vm3 = vcmask 58368   ;;  %s353_s0 = smov [#allocation11]  }
   0xf   :  { %232 = vtanh.f32 %v381_v1  ;;  %50 = vst.msk [vmem:[#allocation2] sm:$0x3] %vm49_vm1, %v350_v9  ;;  %v74_v12 = vand.u32 127, %v73_v11  ;;  %v351_v18 = vmov 0   ;;  %v352_v19 = vmov 0.0   ;;  %s199_s1 = sshll.u32 %s353_s0, 4  ;;  %s200_s1 = int_to_ptr.vmem [resolvable:$true] %s199_s1 }
  0x10   :  { %226 = vset.pattern.permute.xlu1 %v351_v18  ;;  %227 = vset.pattern.permute.xlu2 %v351_v18  ;;  %51 = vst.msk [vmem:[#allocation3] sm:$0x3] %vm49_vm1, %v352_v19  ;;  %vm52_vm4 = vcmask 254976   ;;  %s201_s26 = sshll.u32 %s411_s3, 4  ;;  %s354_s27 = smov [#allocation10]   ;;  %s202_s26 = int_to_ptr.hbm [resolvable:$true] %s201_s26 }
  0x11   :  { %228 = vset.pattern.permute.xlu0 %v351_v18  ;;  %53 = vst.msk [vmem:[#allocation4] sm:$0x3] %vm52_vm4, %v352_v19  ;;  %s188_s28 = sshll.u32 %s354_s27, 4  ;;  %s190_s30 = sshll.u32 %s410_s2, 4  ;;  %s189_s28 = int_to_ptr.vmem [resolvable:$true] %s188_s28  ;;  %s191_s30 = int_to_ptr.hbm [resolvable:$true] %s190_s30 }
  0x14   :  { %v231_v3 = vpop.eup %230 }
  0x15   :  { %v62_v4 = vmul.f32 %v231_v3, %v229_v2  ;;  %v233_v5 = vpop.eup %232 }
  0x16   :  { %v63_v7 = vmul.f32 %v233_v5, %v229_v2  ;;  %v82_v20 = vld [vmem:[#allocation2] sm:$0x3] }
  0x17   :  { %v65_v6 = vsel %vm64_vm0, %v62_v4, 0.0  ;;  %v104_v62 = vld [vmem:[#allocation3] sm:$0x3] }
  0x18   :  { %66 = vadd.xlane.f32.xlu0 %v65_v6  ;;  %v68_v8 = vsel %vm64_vm0, %v63_v7, 0.0  ;;  %v124_v55 = vld [vmem:[#allocation4] sm:$0x3] }
  0x20   :  { %69 = vadd.xlane.f32.xlu0 %v68_v8 }
  0x8b   :  { %v67_v10 = vpop.xlane.xlu0 %66 }
  0x8c   :  { %v75_v14 = vperm.slane %v67_v10, %v74_v12 }
  0x93   :  { %v70_v13 = vpop.xlane.xlu0 %69 }
  0x94   :  { %v76_v15 = vperm.slane %v70_v13, %v74_v12 }
  0x96   :  { %v78_v16 = vsel %vm77_vm2, %v76_v15, %v75_v14 }
  0x97   :  { %v83_v17 = vsel %vm80_vm3, %v78_v16, -inf  ;;  %81 = vst.msk [vmem:[#allocation11] sm:$0x3] %vm80_vm3, %v78_v16 }
  0x98   :  { %84 = vmax.xlane.f32.xlu1 %v83_v17  ;;  %204 = dma.vmem_to_hbm [thread:$0]  %s200_s1, 32, %s202_s26, [#allocation12]  }
 0x10b   :  { %v85_v21 = vpop.xlane.xlu1 %84 }
 0x10c   :  { %v86_v22 = vmax.f32 %v82_v20, %v85_v21 }
 0x10e   :  { %v87_v23 = vsub.f32 %v82_v20, %v86_v22  ;;  %156 = vst.msk [vmem:[#allocation2] sm:$0x3] %vm49_vm1, %v86_v22  ;;  %92 = vperm.xlu1 %226, %v86_v22  }
 0x110   :  { %v88_v32 = vmul.f32 1.442695, %v87_v23 }
 0x180   :  { %v93_v24 = vpop.permute.xlu1 %92 }
 0x181   :  { %v94_v25 = vperm.slane %v93_v24, 0  ;;  %v95_v26 = vperm.slane %v93_v24, 1 }
 0x183   :  { %v98_v27 = vsub.f32 %v67_v10, %v94_v25  ;;  %v99_v29 = vsub.f32 %v70_v13, %v95_v26 }
 0x185   :  { %v100_v28 = vmul.f32 1.442695, %v98_v27  ;;  %v102_v30 = vmul.f32 1.442695, %v99_v29 }
 0x187   :  { %234 = vpow2.f32 %v100_v28 }
 0x188   :  { %236 = vpow2.f32 %v102_v30 }
 0x189   :  { %238 = vpow2.f32 %v88_v32 }
 0x18d   :  { %v235_v31 = vpop.eup %234 }
 0x18e   :  { %109 = vperm.xlu2 %227, %v235_v31   ;;  %v237_v33 = vpop.eup %236 }
 0x18f   :  { %v239_v34 = vpop.eup %238 }
 0x190   :  { %v105_v63 = vmul.f32 %v239_v34, %v104_v62 }
 0x196   :  { %112 = vperm.xlu2 %227, %v237_v33  }
 0x19e   :  { %127 = vperm.xlu2 %227, %v239_v34  }
 0x1e8   :  { %v110_v35 = vpop.permute.xlu2 %109 }
 0x1e9   :  { %v133_v36 = vmul.f32 %v110_v35, %v54_v0  ;;  %v114_v41 = vperm.slane %v110_v35, %v74_v12 }
 0x1eb   :  { %v135_v37 = vsel %vm64_vm0, %v133_v36, 0.0 }
 0x1ec   :  { %v136_v38 = vrot.slane %v135_v37, 4 }
 0x1ee   :  { %v137_v39 = vadd.f32 %v136_v38, %v135_v37 }
 0x1f0   :  { %v113_v40 = vpop.permute.xlu2 %112  ;;  %v138_v44 = vrot.slane %v137_v39, 2 }
 0x1f1   :  { %v115_v42 = vperm.slane %v113_v40, %v74_v12  ;;  %v134_v43 = vmul.f32 %v113_v40, %v381_v1 }
 0x1f2   :  { %v139_v49 = vadd.f32 %v138_v44, %v137_v39 }
 0x1f3   :  { %v142_v45 = vsel %vm64_vm0, %v134_v43, 0.0  ;;  %v116_v46 = vsel %vm77_vm2, %v115_v42, %v114_v41 }
 0x1f4   :  { %v143_v47 = vrot.slane %v142_v45, 4  ;;  %v118_v48 = vsel %vm80_vm3, %v116_v46, 0.0  ;;  %v140_v52 = vrot.slane %v139_v49, 1 }
 0x1f5   :  { %119 = vadd.xlane.f32.xlu0 %v118_v48 }
 0x1f6   :  { %v144_v50 = vadd.f32 %v143_v47, %v142_v45  ;;  %v141_v57 = vadd.f32 %v140_v52, %v139_v49 }
 0x1f8   :  { %v145_v51 = vrot.slane %v144_v50, 2  ;;  %v128_v56 = vpop.permute.xlu2 %127 }
 0x1f9   :  { %v130_v59 = vmul.f32 %v128_v56, %v124_v55 }
 0x1fa   :  { %v146_v53 = vadd.f32 %v145_v51, %v144_v50 }
 0x1fc   :  { %v147_v54 = vrot.slane %v146_v53, 1 }
 0x1fe   :  { %v148_v58 = vadd.f32 %v147_v54, %v146_v53 }
 0x200   :  { %v151_v60 = vsel %vm77_vm2, %v148_v58, %v141_v57 }
 0x201   :  { %v153_v61 = vadd.f32 %v151_v60, %v130_v59 }
 0x203   :  { %155 = vst.msk [vmem:[#allocation4] sm:$0x3] %vm52_vm4, %v153_v61 }
 0x20a   :  { %v160_v13 = vld [vmem:[#allocation4] sm:$0x3] }
 0x268   :  { %v120_v0 = vpop.xlane.xlu0 %119 }
 0x269   :  { %v121_v1 = vadd.f32 %v120_v0, %v105_v63 }
 0x26b   :  { %123 = vst.msk [vmem:[#allocation3] sm:$0x3] %vm49_vm1, %v121_v1 }
 0x272   :  { %v161_v2 = vld [vmem:[#allocation3] sm:$0x3] }
 0x273   :  { %240 = vrcp.f32 %v161_v2  ;;  %v173_v6 = vand.u32 2147483648, %v161_v2  ;;  %v171_v8 = vand.u32 2147483647, %v161_v2  ;;  %vm167_vm6 = vweird.f32 %v161_v2 }
 0x275   :  { %v174_v10 = vor.u32 1.1754944e-38, %v173_v6  ;;  %vm172_vm8 = vcmp.eq.f32.partialorder %v171_v8, 8.507059e+37 }
 0x279   :  { %v241_v3 = vpop.eup %240 }
 0x27a   :  { %v163_v4 = vmul.f32 %v241_v3, %v161_v2  ;;  %vm168_vm5 = vweird.f32 %v241_v3 }
 0x27b   :  { %vm169_vm7 = vmor %vm167_vm6, %vm168_vm5 }
 0x27c   :  { %v164_v5 = vsub.f32 1.0, %v163_v4 }
 0x27e   :  { %v165_v7 = vmul.f32 %v241_v3, %v164_v5 }
 0x280   :  { %v166_v9 = vadd.f32 %v241_v3, %v165_v7 }
 0x282   :  { %v170_v11 = vsel %vm169_vm7, %v241_v3, %v166_v9 }
 0x283   :  { %v175_v12 = vsel %vm172_vm8, %v174_v10, %v170_v11 }
 0x284   :  { %178 = vperm.xlu0 %228, %v175_v12  }
 0x2f6   :  { %v179_v14 = vpop.permute.xlu0 %178 }
 0x2f7   :  { %v181_v15 = vmul.f32 %v179_v14, %v160_v13 }
 0x2f9   :  { %182 = vst.msk [vmem:[#allocation10] sm:$0x3] %vm52_vm4, %v181_v15 }
 0x2fa   :  { %193 = dma.vmem_to_hbm [thread:$0]  %s189_s28, 32, %s191_s30, [#allocation7]  }
 0x2fb   :  { %342 = dma.done.wait [#allocation7], 32  }
 0x2fc   :  { %343 = vsyncadd [#allocation7], 4294967264 }
 0x2fd   :  { %344 = dma.done.wait [#allocation12], 32  }
 0x2fe   :  { %345 = vsyncadd [#allocation12], 4294967264 }
 0x2ff   :  { %213 = vsyncpa [#allocation6], 1 }
 0x300   :  { %214 = vsyncpa [#allocation9], 1 }
 0x301   :  { %215 = vsyncpa [#allocation7], 1 }
 0x302   :  { %216 = vsyncpa [#allocation12], 1 }

</bundles_post_ra>
